<compile_context>
chip_gen: v7x
topology: tpu7x:2x2x1
jax: 0.10.0
libtpu: 0.0.40
codegen_flags: <defaults>
</compile_context>

<pallas_src>
import functools
import math

import jax
import jax.numpy as jnp
from jax import lax
from jax.experimental import pallas as pl
from jax.experimental.pallas import tpu as pltpu

_EPS = 1e-12  # F.normalize default eps


def _round_up(x, n):
    return ((x + n - 1) // n) * n


def _vmem_capacity_bytes():
    """Physical VMEM per TensorCore; conservative (v7x-sized) fallback."""
    try:
        info = pltpu.get_tpu_info()
        for attr in ("vmem_capacity_bytes", "vmem_bytes", "vmem_size_bytes"):
            v = getattr(info, attr, None)
            if v:
                return int(v)
    except Exception:
        pass
    try:
        kind = jax.devices()[0].device_kind.lower()
        if ("v5" in kind) or ("v6" in kind):
            return 128 * 1024 * 1024
    except Exception:
        pass
    return 64 * 1024 * 1024


def _vmem_estimate(tile_m, tile_n, b_pad, F, mxu_bytes, resident_x):
    lane_f = _round_up(F, 128)
    est = 2 * tile_n * lane_f * 4                    # W tile (double buffered, f32)
    est += tile_n * lane_f * mxu_bytes               # normalized-W scratch
    est += 2 * tile_m * tile_n * 4                   # output tile (double buffered)
    est += 2 * _round_up(tile_m, 8) * 128 * 4        # label block (lane padded)
    if resident_x:
        est += 2 * b_pad * lane_f * 4                # resident x block
        est += b_pad * lane_f * mxu_bytes            # normalized/scaled x scratch
    else:
        est += 2 * tile_m * lane_f * 4               # streamed x tile
    return est


def _plan(B, F, O, mxu_bytes, tile_m_req, tile_n_req):
    """Pick (tile_m, tile_n, b_pad, o_pad, resident_x, vmem_limit)."""
    vmem_phys = _vmem_capacity_bytes()
    small_vmem = vmem_phys <= 72 * 1024 * 1024             # v7x-class (64 MiB / TC)
    budget = (52 if small_vmem else 100) * 1024 * 1024
    budget = min(budget, vmem_phys - (8 << 20))

    # Batch tile: 256 matches the 256-wide MXU on v6e/v7x; shrink while padded
    # batch rows exceed ~25% (keeps multiples of 16 for packed bf16 slicing).
    tm = 256 if tile_m_req is None else int(tile_m_req)
    tm = _round_up(min(tm, _round_up(B, 8)), 8)
    if tile_m_req is None:
        while tm > 16 and 4 * (_round_up(B, tm) - B) > _round_up(B, tm):
            tm //= 2
    b_pad = _round_up(B, tm)

    # Class tile: biggest multiple of 128 that fits the VMEM budget; on 2-TC
    # chips keep >= 2 class tiles so both cores get work.
    o128 = _round_up(O, 128)
    if tile_n_req is not None:
        cand = [min(_round_up(int(tile_n_req), 128), o128)]
    else:
        cap = o128
        if small_vmem and o128 >= 256:
            cap = _round_up(-(-o128 // 2), 128)
        cap = min(cap, 2048)
        cand = list(range(cap, 0, -128))

    for resident_x in (True, False):
        for tn in cand:
            if _vmem_estimate(tm, tn, b_pad, F, mxu_bytes, resident_x) <= budget:
                return tm, tn, b_pad, _round_up(O, tn), resident_x, budget

    tn = cand[-1]
    est = _vmem_estimate(tm, tn, b_pad, F, mxu_bytes, False)
    limit = max(budget, min(int(1.25 * est), vmem_phys - (4 << 20)))
    return tm, tn, b_pad, _round_up(O, tn), False, limit


def _arcmargin_kernel(x_ref, w_ref, label_ref, out_ref, wn_ref, *rest,
                      s, cos_m, sin_m, th, mm, easy_margin,
                      tile_m, tile_n, resident_x, mxu_dtype):
    o = pl.program_id(0)          # class-tile index (outer, "parallel")
    b = pl.program_id(1)          # batch-tile index (inner, "arbitrary")

    # Normalize the resident (tile_n, F) weight tile once per class tile; the
    # normalized copy lives in VMEM scratch for all inner batch iterations.
    @pl.when(b == 0)
    def _():
        w = w_ref[...]
        ssq = jnp.sum(w * w, axis=-1, keepdims=True)
        wn_ref[...] = (w * lax.rsqrt(jnp.maximum(ssq, _EPS * _EPS))
                       ).astype(wn_ref.dtype)

    # Normalized activations, pre-scaled by s so the matmul emits s*cosine
    # directly (saves one full-tile multiply per step).
    if resident_x:
        xs_ref, = rest
        # x is one resident (b_pad, F) block; normalize the whole batch into
        # VMEM scratch once per class tile.  The b == 0 guard keeps this
        # megacore-safe (each core rebuilds its own copy; cost ~1/tile_n of
        # the class tile's matmul work).
        @pl.when(b == 0)
        def _():
            x = x_ref[...]
            ssq = jnp.sum(x * x, axis=-1, keepdims=True)
            xs_ref[...] = (x * (s * lax.rsqrt(jnp.maximum(ssq, _EPS * _EPS)))
                           ).astype(xs_ref.dtype)
        row0 = pl.multiple_of(b * tile_m, tile_m)
        xs = xs_ref[pl.ds(row0, tile_m), :].astype(mxu_dtype)
    else:
        x = x_ref[...]
        ssq = jnp.sum(x * x, axis=-1, keepdims=True)
        xs = (x * (s * lax.rsqrt(jnp.maximum(ssq, _EPS * _EPS)))).astype(mxu_dtype)

    # cos_s = s * (xn @ wn.T): contract the feature axis of both operands on
    # the MXU (no materialized transpose of W), f32 accumulation.
    # TODO(synk): if lowering ever shows a per-step RHS transpose here, store
    # wn_ref transposed (F, tile_n) under the b == 0 guard instead (amortized).
    cos_s = lax.dot_general(xs, wn_ref[...],
                            dimension_numbers=(((1,), (1,)), ((), ())),
                            preferred_element_type=jnp.float32)

    # Per-row margin fix-up: only the label column differs from s*cosine, so
    # the sqrt/select margin math runs on a (tile_m, 1) vector, not the tile.
    col = lax.broadcasted_iota(jnp.int32, cos_s.shape, 1)
    mask = col == (label_ref[...] - o * tile_n)               # row-wise one-hot
    tgt_s = jnp.sum(jnp.where(mask, cos_s, 0.0), axis=-1, keepdims=True)
    tgt = tgt_s * (1.0 / s)                                   # label-column cosine
    sine = jnp.sqrt(jnp.clip(1.0 - tgt * tgt, 0.0, 1.0))
    phi = tgt * cos_m - sine * sin_m
    if easy_margin:
        phi = jnp.where(tgt > 0.0, phi, tgt)
    else:
        phi = jnp.where(tgt > th, phi, tgt - mm)
    delta_s = phi * s - tgt_s                                 # (tile_m, 1)
    out_ref[...] = (cos_s + jnp.where(mask, delta_s, 0.0)).astype(out_ref.dtype)


def arc_margin_product(x, weight, label, *, s=30.0, m=0.5, easy_margin=False,
                       tile_m=None, tile_n=None, mxu_dtype=jnp.bfloat16):
    """ArcFace forward. x:(B,F) f32, weight:(O,F) f32, label:(B,) int -> (B,O) f32.

    mxu_dtype=jnp.bfloat16 (default) runs the cosine matmul in bf16 on the MXU
    with f32 accumulation; all normalization and margin math stay f32.
    """
    B, F = x.shape
    O, F2 = weight.shape
    assert F == F2, "feature dims must match"

    mxu_bytes = jnp.dtype(mxu_dtype).itemsize
    tm, tn, b_pad, o_pad, resident_x, vmem_limit = _plan(
        B, F, O, mxu_bytes, tile_m, tile_n)

    if b_pad != B:
        x = jnp.pad(x, ((0, b_pad - B), (0, 0)))
        label = jnp.pad(label, (0, b_pad - B))
    if o_pad != O:
        weight = jnp.pad(weight, ((0, o_pad - O), (0, 0)))
    label2d = label.reshape(b_pad, 1).astype(jnp.int32)

    # Keep the normalized-x scratch f32 if a user-supplied odd tile_m would
    # produce sub-lane slice offsets unaligned to the packed (16,128) bf16 tile.
    xs_dtype = mxu_dtype
    if (resident_x and b_pad != tm and tm % 16 != 0
            and jnp.dtype(mxu_dtype).itemsize < 4):
        xs_dtype = jnp.float32

    kernel = functools.partial(
        _arcmargin_kernel,
        s=float(s), cos_m=math.cos(m), sin_m=math.sin(m),
        th=math.cos(math.pi - m), mm=math.sin(math.pi - m) * m,
        easy_margin=bool(easy_margin), tile_m=tm, tile_n=tn,
        resident_x=resident_x, mxu_dtype=mxu_dtype)

    if resident_x:
        x_spec = pl.BlockSpec((b_pad, F), lambda o, b: (0, 0))   # resident block
        scratch = [pltpu.VMEM((tn, F), mxu_dtype),               # normalized W
                   pltpu.VMEM((b_pad, F), xs_dtype)]             # normalized s*x
    else:
        x_spec = pl.BlockSpec((tm, F), lambda o, b: (b, 0))
        scratch = [pltpu.VMEM((tn, F), mxu_dtype)]

    out = pl.pallas_call(
        kernel,
        out_shape=jax.ShapeDtypeStruct((b_pad, o_pad), jnp.float32),
        grid_spec=pltpu.PrefetchScalarGridSpec(
            num_scalar_prefetch=0,
            grid=(o_pad // tn, b_pad // tm),                     # B axis innermost
            in_specs=[
                x_spec,
                pl.BlockSpec((tn, F), lambda o, b: (o, 0)),      # W: resident over B
                pl.BlockSpec((tm, 1), lambda o, b: (b, 0)),      # labels
            ],
            out_specs=pl.BlockSpec((tm, tn), lambda o, b: (b, o)),
            scratch_shapes=scratch),
        compiler_params=pltpu.CompilerParams(
            # Class tiles are independent -> megacore-shardable (v7x).  The B
            # axis carries the normalized-W / normalized-x scratches, so it
            # stays "arbitrary".
            dimension_semantics=("parallel", "arbitrary"),
            vmem_limit_bytes=int(vmem_limit)),
    )(x, weight, label2d)

    return out[:B, :O]


def _reference(x, weight, label, *, s=30.0, m=0.5, easy_margin=False):
    # Pure-JAX reference mirroring the PyTorch forward.
    eps = 1e-12
    xn = x / jnp.maximum(jnp.linalg.norm(x, axis=1, keepdims=True), eps)
    wn = weight / jnp.maximum(jnp.linalg.norm(weight, axis=1, keepdims=True), eps)
    cosine = xn @ wn.T
    sine = jnp.sqrt(jnp.clip(1.0 - cosine ** 2, 0.0, 1.0))
    phi = cosine * math.cos(m) - sine * math.sin(m)
    if easy_margin:
        phi = jnp.where(cosine > 0, phi, cosine)
    else:
        phi = jnp.where(cosine > math.cos(math.pi - m),
                        phi, cosine - math.sin(math.pi - m) * m)
    one_hot = jax.nn.one_hot(label, weight.shape[0], dtype=jnp.float32)
    return (one_hot * phi + (1.0 - one_hot) * cosine) * s


if __name__ == "__main__":
    S, M = 30.0, 0.5

    # --- 1) toy shapes from the module: batch=8, in=32, out=128 (f32 MXU) ---
    B, IN_F, OUT_F = 8, 32, 128
    kx, kw, kl = jax.random.split(jax.random.PRNGKey(0), 3)
    x = jax.random.normal(kx, (B, IN_F), dtype=jnp.float32)
    bound = math.sqrt(6.0 / (IN_F + OUT_F))  # xavier_uniform on (out, in)
    weight = jax.random.uniform(kw, (OUT_F, IN_F), jnp.float32, -bound, bound)
    label = jax.random.randint(kl, (B,), 0, OUT_F, dtype=jnp.int32)

    out = jax.block_until_ready(
        arc_margin_product(x, weight, label, s=S, m=M, easy_margin=False,
                           mxu_dtype=jnp.float32))
    ref = _reference(x, weight, label, s=S, m=M, easy_margin=False)
    assert out.shape == (B, OUT_F)
    assert jnp.allclose(out, ref, atol=1e-3, rtol=1e-3), "f32 toy mismatch"

    # --- 2) multi-tile + padded shapes, easy_margin branch (f32 MXU) ---
    B2, F2_, O2 = 272, 48, 1100
    k2x, k2w, k2l = jax.random.split(jax.random.PRNGKey(1), 3)
    x2 = jax.random.normal(k2x, (B2, F2_), dtype=jnp.float32)
    bound2 = math.sqrt(6.0 / (F2_ + O2))
    w2 = jax.random.uniform(k2w, (O2, F2_), jnp.float32, -bound2, bound2)
    l2 = jax.random.randint(k2l, (B2,), 0, O2, dtype=jnp.int32)

    out2 = jax.block_until_ready(
        arc_margin_product(x2, w2, l2, s=S, m=M, easy_margin=True,
                           mxu_dtype=jnp.float32))
    ref2 = _reference(x2, w2, l2, s=S, m=M, easy_margin=True)
    assert out2.shape == (B2, O2)
    assert jnp.allclose(out2, ref2, atol=1e-3, rtol=1e-3), "f32 tiled mismatch"

    # --- 3) same shapes with the bf16 MXU default (f32 accumulate + margin) ---
    out3 = jax.block_until_ready(
        arc_margin_product(x2, w2, l2, s=S, m=M, easy_margin=False))
    ref3 = _reference(x2, w2, l2, s=S, m=M, easy_margin=False)
    assert out3.shape == (B2, O2)
    assert jnp.allclose(out3, ref3, atol=1.5e-1, rtol=2e-2), "bf16 tiled mismatch"

    print("KERNEL_OK")
</pallas_src>

<mosaic_0001>
module attributes {stable_mosaic.version = 11 : i64} {
  func.func @_arcmargin_kernel(%arg0: i32, %arg1: i32, %arg2: memref<8x32xf32, #tpu.memory_space<vmem>>, %arg3: memref<128x32xf32, #tpu.memory_space<vmem>>, %arg4: memref<8x1xi32, #tpu.memory_space<vmem>>, %arg5: memref<8x128xf32, #tpu.memory_space<vmem>>, %arg6: memref<128x32xf32, #tpu.memory_space<vmem>>, %arg7: memref<8x32xf32, #tpu.memory_space<vmem>>) attributes {dimension_semantics = [#tpu.dimension_semantics<parallel>, #tpu.dimension_semantics<arbitrary>], iteration_bounds = array<i64: 1, 1>, scalar_prefetch = 0 : i64, scratch_operands = 2 : i64, tpu.core_type = #tpu.core_type<tc>, window_params = [{pipeline_mode = #tpu.pipeline_mode<synchronous>, transform_indices = @transform_0, window_bounds = array<i64: 8, 32>}, {transform_indices = @transform_1, window_bounds = array<i64: 128, 32>}, {transform_indices = @transform_2, window_bounds = array<i64: 8, 1>}, {transform_indices = @transform_3, window_bounds = array<i64: 8, 128>}]} {
    %c0_i32 = arith.constant 0 : i32
    %0 = arith.cmpi eq, %arg1, %c0_i32 : i32
    %1 = arith.extui %0 : i1 to i32
    %c0_i32_0 = arith.constant 0 : i32
    %2 = arith.cmpi ne, %1, %c0_i32_0 : i32
    scf.if %2 {
      %c0_21 = arith.constant 0 : index
      %c0_22 = arith.constant 0 : index
      %52 = vector.load %arg3[%c0_21, %c0_22] : memref<128x32xf32, #tpu.memory_space<vmem>>, vector<128x32xf32>
      %53 = arith.mulf %52, %52 : vector<128x32xf32>
      %cst_23 = arith.constant dense<0.000000e+00> : vector<128xf32>
      %54 = vector.multi_reduction <add>, %53, %cst_23 [1] : vector<128x32xf32> to vector<128xf32>
      %55 = vector.shape_cast %54 : vector<128xf32> to vector<128x1xf32>
      %cst_24 = arith.constant 1.000000e-24 : f32
      %56 = vector.broadcast %cst_24 : f32 to vector<128x1xf32>
      %57 = arith.maximumf %55, %56 : vector<128x1xf32>
      %58 = math.rsqrt %57 : vector<128x1xf32>
      %59 = vector.broadcast %58 : vector<128x1xf32> to vector<128x32xf32>
      %60 = arith.mulf %52, %59 : vector<128x32xf32>
      %c0_25 = arith.constant 0 : index
      %c0_26 = arith.constant 0 : index
      %61 = vector.load %arg6[%c0_25, %c0_26] : memref<128x32xf32, #tpu.memory_space<vmem>>, vector<128x32xf32>
      tpu.vector_store %arg6[%c0_25, %c0_26], %60 {strides = array<i32>} : memref<128x32xf32, #tpu.memory_space<vmem>>, vector<128x32xf32>,
    } else {
    }
    %c0_i32_1 = arith.constant 0 : i32
    %3 = arith.cmpi eq, %arg1, %c0_i32_1 : i32
    %4 = arith.extui %3 : i1 to i32
    %c0_i32_2 = arith.constant 0 : i32
    %5 = arith.cmpi ne, %4, %c0_i32_2 : i32
    scf.if %5 {
      %c0_21 = arith.constant 0 : index
      %c0_22 = arith.constant 0 : index
      %52 = vector.load %arg2[%c0_21, %c0_22] : memref<8x32xf32, #tpu.memory_space<vmem>>, vector<8x32xf32>
      %53 = arith.mulf %52, %52 : vector<8x32xf32>
      %cst_23 = arith.constant dense<0.000000e+00> : vector<8xf32>
      %54 = vector.multi_reduction <add>, %53, %cst_23 [1] : vector<8x32xf32> to vector<8xf32>
      %55 = vector.shape_cast %54 : vector<8xf32> to vector<8x1xf32>
      %cst_24 = arith.constant 1.000000e-24 : f32
      %56 = vector.broadcast %cst_24 : f32 to vector<8x1xf32>
      %57 = arith.maximumf %55, %56 : vector<8x1xf32>
      %58 = math.rsqrt %57 : vector<8x1xf32>
      %cst_25 = arith.constant 3.000000e+01 : f32
      %59 = vector.broadcast %cst_25 : f32 to vector<8x1xf32>
      %60 = arith.mulf %59, %58 : vector<8x1xf32>
      %61 = vector.broadcast %60 : vector<8x1xf32> to vector<8x32xf32>
      %62 = arith.mulf %52, %61 : vector<8x32xf32>
      %c0_26 = arith.constant 0 : index
      %c0_27 = arith.constant 0 : index
      %63 = vector.load %arg7[%c0_26, %c0_27] : memref<8x32xf32, #tpu.memory_space<vmem>>, vector<8x32xf32>
      tpu.vector_store %arg7[%c0_26, %c0_27], %62 {strides = array<i32>} : memref<8x32xf32, #tpu.memory_space<vmem>>, vector<8x32xf32>,
    } else {
    }
    %c8_i32 = arith.constant 8 : i32
    %6 = arith.muli %arg1, %c8_i32 : i32
    %7 = tpu.assume_multiple %6, 8 : i32
    %8 = arith.index_cast %7 : i32 to index
    %c0 = arith.constant 0 : index
    %9 = vector.load %arg7[%8, %c0] : memref<8x32xf32, #tpu.memory_space<vmem>>, vector<8x32xf32>
    %c0_3 = arith.constant 0 : index
    %c0_4 = arith.constant 0 : index
    %10 = vector.load %arg6[%c0_3, %c0_4] : memref<128x32xf32, #tpu.memory_space<vmem>>, vector<128x32xf32>
    %cst = arith.constant dense<0.000000e+00> : vector<8x128xf32>
    %11 = tpu.matmul %9, %10, %cst {dimension_numbers = #tpu.dot_dimension_numbers<[1], [1], [0], [0], [0, 0, 1, 0], [], []>} : vector<8x32xf32>, vector<128x32xf32>, vector<8x128xf32> -> vector<8x128xf32>
    %12 = tpu.iota {dimensions = array<i32: 1>} : vector<8x128xi32>
    %c0_5 = arith.constant 0 : index
    %c0_6 = arith.constant 0 : index
    %13 = vector.load %arg4[%c0_5, %c0_6] : memref<8x1xi32, #tpu.memory_space<vmem>>, vector<8x1xi32>
    %c128_i32 = arith.constant 128 : i32
    %14 = arith.muli %arg0, %c128_i32 : i32
    %15 = vector.broadcast %14 : i32 to vector<8x1xi32>
    %16 = arith.subi %13, %15 : vector<8x1xi32>
    %17 = vector.broadcast %16 : vector<8x1xi32> to vector<8x128xi32>
    %18 = arith.cmpi eq, %12, %17 : vector<8x128xi32>
    %cst_7 = arith.constant 0.000000e+00 : f32
    %19 = vector.broadcast %cst_7 : f32 to vector<8x128xf32>
    %20 = arith.select %18, %11, %19 : vector<8x128xi1>, vector<8x128xf32>
    %cst_8 = arith.constant dense<0.000000e+00> : vector<8xf32>
    %21 = vector.multi_reduction <add>, %20, %cst_8 [1] : vector<8x128xf32> to vector<8xf32>
    %22 = vector.shape_cast %21 : vector<8xf32> to vector<8x1xf32>
    %cst_9 = arith.constant 0.0333333351 : f32
    %23 = vector.broadcast %cst_9 : f32 to vector<8x1xf32>
    %24 = arith.mulf %22, %23 : vector<8x1xf32>
    %25 = arith.mulf %24, %24 : vector<8x1xf32>
    %cst_10 = arith.constant 1.000000e+00 : f32
    %26 = vector.broadcast %cst_10 : f32 to vector<8x1xf32>
    %27 = arith.subf %26, %25 : vector<8x1xf32>
    %cst_11 = arith.constant 0.000000e+00 : f32
    %cst_12 = arith.constant 1.000000e+00 : f32
    %28 = vector.broadcast %cst_11 : f32 to vector<8x1xf32>
    %29 = arith.maximumf %28, %27 : vector<8x1xf32>
    %30 = vector.broadcast %cst_12 : f32 to vector<8x1xf32>
    %31 = arith.minimumf %30, %29 : vector<8x1xf32>
    %32 = math.sqrt %31 : vector<8x1xf32>
    %cst_13 = arith.constant 0.87758255 : f32
    %33 = vector.broadcast %cst_13 : f32 to vector<8x1xf32>
    %34 = arith.mulf %24, %33 : vector<8x1xf32>
    %cst_14 = arith.constant 0.47942555 : f32
    %35 = vector.broadcast %cst_14 : f32 to vector<8x1xf32>
    %36 = arith.mulf %32, %35 : vector<8x1xf32>
    %37 = arith.subf %34, %36 : vector<8x1xf32>
    %cst_15 = arith.constant -0.87758255 : f32
    %38 = vector.broadcast %cst_15 : f32 to vector<8x1xf32>
    %39 = arith.cmpf ogt, %24, %38 : vector<8x1xf32>
    %cst_16 = arith.constant 0.239712775 : f32
    %40 = vector.broadcast %cst_16 : f32 to vector<8x1xf32>
    %41 = arith.subf %24, %40 : vector<8x1xf32>
    %42 = arith.select %39, %37, %41 : vector<8x1xi1>, vector<8x1xf32>
    %cst_17 = arith.constant 3.000000e+01 : f32
    %43 = vector.broadcast %cst_17 : f32 to vector<8x1xf32>
    %44 = arith.mulf %42, %43 : vector<8x1xf32>
    %45 = arith.subf %44, %22 : vector<8x1xf32>
    %cst_18 = arith.constant 0.000000e+00 : f32
    %46 = vector.shape_cast %45 : vector<8x1xf32> to vector<8x1xf32>
    %47 = vector.broadcast %46 : vector<8x1xf32> to vector<8x128xf32>
    %48 = vector.broadcast %cst_18 : f32 to vector<8x128xf32>
    %49 = arith.select %18, %47, %48 : vector<8x128xi1>, vector<8x128xf32>
    %50 = arith.addf %11, %49 : vector<8x128xf32>
    %c0_19 = arith.constant 0 : index
    %c0_20 = arith.constant 0 : index
    %51 = vector.load %arg5[%c0_19, %c0_20] : memref<8x128xf32, #tpu.memory_space<vmem>>, vector<8x128xf32>
    tpu.vector_store %arg5[%c0_19, %c0_20], %50 {strides = array<i32>} : memref<8x128xf32, #tpu.memory_space<vmem>>, vector<8x128xf32>,
    return
  }
  func.func @transform_0(%arg0: i32, %arg1: i32) -> (i32, i32) {
    %c0_i32 = arith.constant 0 : i32
    %c0_i32_0 = arith.constant 0 : i32
    %c0_i32_1 = arith.constant 0 : i32
    return %c0_i32, %c0_i32_0 : i32, i32
  }
  func.func @transform_1(%arg0: i32, %arg1: i32) -> (i32, i32) {
    %c0_i32 = arith.constant 0 : i32
    %c0_i32_0 = arith.constant 0 : i32
    return %arg0, %c0_i32 : i32, i32
  }
  func.func @transform_2(%arg0: i32, %arg1: i32) -> (i32, i32) {
    %c0_i32 = arith.constant 0 : i32
    %c0_i32_0 = arith.constant 0 : i32
    return %arg1, %c0_i32 : i32, i32
  }
  func.func @transform_3(%arg0: i32, %arg1: i32) -> (i32, i32) {
    %c0_i32 = arith.constant 0 : i32
    return %arg1, %arg0 : i32, i32
  }
}

</mosaic_0001>

<bundles_post_ra>
// kernel: tpu_custom_call.1
= control target key start
LH: loop header
LB: loop body
LE: loop exit
PB: predicated region body
PF: predicated region fallthrough
CT: control target
= control target key end

     0   :  { %vm51_vm0 = vcmask 261120   ;;  %s777_s0 = inlined_call_operand.vmem [shape: f32[8,32], index: 0, kind: input, shape index: {}]   ;;  %s778_s1 = inlined_call_operand.vmem [shape: f32[128,32], index: 1, kind: input, shape index: {}]   ;;  %s779_s2 = inlined_call_operand.vmem [shape: s32[8,1], index: 2, kind: input, shape index: {}]   ;;  %s780_s3 = inlined_call_operand.hbm [shape: f32[8,128], index: 3, kind: output, shape index: {}]  }
   0x1   :  { %v562_v0 = vld [vmem:[%s778_s1] sm:$0xff]  ;;  %v567_v1 = vld [vmem:[%s778_s1 + $0x10] sm:$0xff]  ;;  %v572_v2 = vld [vmem:[%s778_s1 + $0x8] sm:$0xff] }
   0x2   :  { %v35_v3 = vmul.f32 %v562_v0, %v562_v0  ;;  %v37_v4 = vmul.f32 %v567_v1, %v567_v1  ;;  %v36_v5 = vmul.f32 %v572_v2, %v572_v2  ;;  %v583_v6 = vld [vmem:[%s778_s1 + $0x18] sm:$0xff]  ;;  %v590_v8 = vld [vmem:[%s778_s1 + $0x28] sm:$0xff]  ;;  %v595_v9 = vld [vmem:[%s778_s1 + $0x20] sm:$0xff] }
   0x3   :  { %v38_v7 = vmul.f32 %v583_v6, %v583_v6  ;;  %v40_v14 = vmul.f32 %v590_v8, %v590_v8  ;;  %v39_v15 = vmul.f32 %v595_v9, %v595_v9 }
   0x4   :  { %v52_v10 = vsel %vm51_vm0, %v35_v3, 0.0  ;;  %v58_v11 = vsel %vm51_vm0, %v37_v4, 0.0  ;;  %v55_v12 = vsel %vm51_vm0, %v36_v5, 0.0 }
   0x5   :  { %53 = vadd.xlane.f32.xlu0 %v52_v10  ;;  %59 = vadd.xlane.f32.xlu1 %v58_v11  ;;  %v61_v13 = vsel %vm51_vm0, %v38_v7, 0.0 }
   0x6   :  { %8 = vsyncpa [#allocation5], 0  ;;  %v608_v16 = vld [vmem:[%s778_s1 + $0x38] sm:$0xff]  ;;  %v613_v17 = vld [vmem:[%s778_s1 + $0x30] sm:$0xff]  ;;  %v67_v18 = vsel %vm51_vm0, %v40_v14, 0.0  ;;  %v64_v19 = vsel %vm51_vm0, %v39_v15, 0.0 }
   0x7   :  { %v42_v20 = vmul.f32 %v608_v16, %v608_v16  ;;  %v41_v21 = vmul.f32 %v613_v17, %v613_v17  ;;  %v624_v22 = vld [vmem:[%s778_s1 + $0x48] sm:$0xff]  ;;  %v629_v23 = vld [vmem:[%s778_s1 + $0x40] sm:$0xff]  ;;  %v640_v28 = vld [vmem:[%s778_s1 + $0x58] sm:$0xff]  ;;  %v534_v51 = vmov 0.0|0.0   ;;  %vm535_vm1 = vmmov 0  }
   0x8   :  { %v44_v26 = vmul.f32 %v624_v22, %v624_v22  ;;  %v43_v27 = vmul.f32 %v629_v23, %v629_v23  ;;  %v645_v29 = vld [vmem:[%s778_s1 + $0x50] sm:$0xff]  ;;  %v46_v32 = vmul.f32 %v640_v28, %v640_v28  ;;  %v656_v34 = vld [vmem:[%s778_s1 + $0x68] sm:$0xff]  ;;  %v661_v35 = vld [vmem:[%s778_s1 + $0x60] sm:$0xff]  ;;  %435 = vmatprep.subr.bf16.mxu0 %v534_v51  ;;  %v536_v52 = vmov 0.0  }
   0x9   :  { %56 = vadd.xlane.f32.xlu0 %v55_v12  ;;  %62 = vadd.xlane.f32.xlu1 %v61_v13  ;;  %v73_v24 = vsel %vm51_vm0, %v42_v20, 0.0  ;;  %v70_v25 = vsel %vm51_vm0, %v41_v21, 0.0  ;;  %v45_v33 = vmul.f32 %v645_v29, %v645_v29  ;;  %v48_v38 = vmul.f32 %v656_v34, %v656_v34  ;;  %v672_v40 = vld [vmem:[%s778_s1 + $0x78] sm:$0xff]  ;;  %v677_v41 = vld [vmem:[%s778_s1 + $0x70] sm:$0xff]  ;;  %v688_v46 = vld [vmem:[%s777_s0] sm:$0xff] }
   0xa   :  { %v79_v30 = vsel %vm51_vm0, %v44_v26, 0.0  ;;  %v76_v31 = vsel %vm51_vm0, %v43_v27, 0.0  ;;  %v85_v36 = vsel %vm51_vm0, %v46_v32, 0.0  ;;  %v47_v39 = vmul.f32 %v661_v35, %v661_v35  ;;  %432 = vmatprep.mubr.msk.f32.mxu0 %vm535_vm1, %v536_v52  ;;  %v317_v53 = vld [vmem:[%s779_s2] sm:$0xff]  ;;  %vm715_vm2 = vmpackc.low %vm51_vm0, %vm51_vm0  ;;  %s538_s2 = smov [#allocation4]  }
   0xb   :  { %v82_v37 = vsel %vm51_vm0, %v45_v33, 0.0  ;;  %v91_v42 = vsel %vm51_vm0, %v48_v38, 0.0  ;;  %v50_v44 = vmul.f32 %v672_v40, %v672_v40  ;;  %v49_v45 = vmul.f32 %v677_v41, %v677_v41  ;;  %s357_s19 = sshll.u32 %s538_s2, 4  ;;  %s358_s19 = int_to_ptr.vmem [resolvable:$true] %s357_s19 }
   0xc   :  { %v88_v43 = vsel %vm51_vm0, %v47_v39, 0.0  ;;  %v165_v49 = vmul.f32 %v688_v46, %v688_v46  ;;  %v537_v54 = vmov 0   ;;  %s510_s20 = scalar_lea.vmem %s358_s19, 128  ;;  %p515_p1 = scmp.lt.s32.totalorder %s358_s19, %s358_s19 }
   0xd   :  { %68 = vadd.xlane.f32.xlu1 %v67_v18  ;;  %65 = vadd.xlane.f32.xlu0 %v64_v19  ;;  %v97_v47 = vsel %vm51_vm0, %v50_v44, 0.0  ;;  %v94_v48 = vsel %vm51_vm0, %v49_v45, 0.0  ;;  %p511_p0 = scmp.ne.s32.totalorder %s358_s19, %s510_s20  ;;  %p516_p2 = scmp.lt.s32.totalorder %s510_s20, %s510_s20 }
   0xe   :  { %v166_v50 = vsel %vm51_vm0, %v165_v49, 0.0  ;;  %472 = vset.pattern.permute.xlu1 %v537_v54  ;;  %473 = vset.pattern.permute.xlu0 %v537_v54 }
   0xf   :  { %p517_p3 = por %p516_p2, %p515_p1 }
  0x11   :  { %74 = vadd.xlane.f32.xlu1 %v73_v24  ;;  %71 = vadd.xlane.f32.xlu0 %v70_v25  ;;  %p518_p4 = pnand %p517_p3, %p511_p0 }
  0x15   :  { %80 = vadd.xlane.f32.xlu1 %v79_v30  ;;  %77 = vadd.xlane.f32.xlu0 %v76_v31 }
  0x19   :  { %86 = vadd.xlane.f32.xlu1 %v85_v36  ;;  %83 = vadd.xlane.f32.xlu0 %v82_v37 }
  0x1d   :  { %92 = vadd.xlane.f32.xlu1 %v91_v42  ;;  %89 = vadd.xlane.f32.xlu0 %v88_v43 }
  0x21   :  { %98 = vadd.xlane.f32.xlu1 %v97_v47  ;;  %95 = vadd.xlane.f32.xlu0 %v94_v48 }
  0x25   :  { %167 = vadd.xlane.f32.xlu0 %v166_v50 }
  0x32   :  { %322 = vperm.xlu1 %472, %v317_v53  }
  0x92   :  { %v54_v55 = vpop.xlane.xlu0 %53  ;;  %v60_v56 = vpop.xlane.xlu1 %59 }
  0x93   :  { %v100_v57 = vmax.f32 %v54_v55, 1e-24  ;;  %v102_v58 = vmax.f32 %v60_v56, 1e-24 }
  0x95   :  { %474 = vrsqrt.f32 %v100_v57 }
  0x96   :  { %476 = vrsqrt.f32 %v102_v58  ;;  %v57_v59 = vpop.xlane.xlu0 %56  ;;  %v63_v60 = vpop.xlane.xlu1 %62 }
  0x97   :  { %v101_v61 = vmax.f32 %v57_v59, 1e-24  ;;  %v103_v62 = vmax.f32 %v63_v60, 1e-24 }
  0x99   :  { %478 = vrsqrt.f32 %v101_v61 }
  0x9a   :  { %480 = vrsqrt.f32 %v103_v62  ;;  %v69_v63 = vpop.xlane.xlu1 %68  ;;  %v66_v3 = vpop.xlane.xlu0 %65 }
  0x9b   :  { %v105_v4 = vmax.f32 %v69_v63, 1e-24  ;;  %v104_v5 = vmax.f32 %v66_v3, 1e-24 }
  0x9d   :  { %482 = vrsqrt.f32 %v105_v4 }
  0x9e   :  { %484 = vrsqrt.f32 %v104_v5  ;;  %v75_v7 = vpop.xlane.xlu1 %74  ;;  %v72_v10 = vpop.xlane.xlu0 %71 }
  0x9f   :  { %v475_v11 = vpop.eup %474  ;;  %v107_v12 = vmax.f32 %v75_v7, 1e-24  ;;  %v106_v13 = vmax.f32 %v72_v10, 1e-24 }
  0xa0   :  { %v477_v14 = vpop.eup %476  ;;  %v132_v15 = vmul.f32 %v475_v11, %v562_v0 }
  0xa1   :  { %v134_v18 = vmul.f32 %v477_v14, %v567_v1  ;;  %486 = vrsqrt.f32 %v107_v12 }
  0xa2   :  { %148 = vst.msk [vmem:[#allocation2] sm:$0xff] %vm51_vm0, %v132_v15  ;;  %488 = vrsqrt.f32 %v106_v13  ;;  %v81_v19 = vpop.xlane.xlu1 %80  ;;  %v78_v20 = vpop.xlane.xlu0 %77 }
  0xa3   :  { %v479_v21 = vpop.eup %478  ;;  %150 = vst.msk [vmem:[#allocation2 + $0x10] sm:$0xff] %vm51_vm0, %v134_v18  ;;  %v109_v24 = vmax.f32 %v81_v19, 1e-24  ;;  %v108_v25 = vmax.f32 %v78_v20, 1e-24 }
  0xa4   :  { %v481_v26 = vpop.eup %480  ;;  %v133_v27 = vmul.f32 %v479_v21, %v572_v2 }
  0xa5   :  { %v135_v30 = vmul.f32 %v481_v26, %v583_v6  ;;  %490 = vrsqrt.f32 %v109_v24 }
  0xa6   :  { %149 = vst.msk [vmem:[#allocation2 + $0x8] sm:$0xff] %vm51_vm0, %v133_v27  ;;  %492 = vrsqrt.f32 %v108_v25  ;;  %v87_v0 = vpop.xlane.xlu1 %86  ;;  %v84_v1 = vpop.xlane.xlu0 %83 }
  0xa7   :  { %v483_v31 = vpop.eup %482  ;;  %151 = vst.msk [vmem:[#allocation2 + $0x18] sm:$0xff] %vm51_vm0, %v135_v30  ;;  %v111_v32 = vmax.f32 %v87_v0, 1e-24  ;;  %v110_v33 = vmax.f32 %v84_v1, 1e-24 }
  0xa8   :  { %v485_v36 = vpop.eup %484  ;;  %v137_v37 = vmul.f32 %v483_v31, %v590_v8 }
  0xa9   :  { %v136_v38 = vmul.f32 %v485_v36, %v595_v9  ;;  %494 = vrsqrt.f32 %v111_v32  ;;  %v177_v48 = vld [vmem:[#allocation2] sm:$0xff] }
  0xaa   :  { %153 = vst.msk [vmem:[#allocation2 + $0x28] sm:$0xff] %vm51_vm0, %v137_v37  ;;  %496 = vrsqrt.f32 %v110_v33  ;;  %v93_v2 = vpop.xlane.xlu1 %92  ;;  %v90_v6 = vpop.xlane.xlu0 %89  ;;  %v179_v59 = vld [vmem:[#allocation2 + $0x10] sm:$0xff]  ;;  %v315_v33 = vlaneseq }
  0xab   :  { %v487_v39 = vpop.eup %486  ;;  %152 = vst.msk [vmem:[#allocation2 + $0x20] sm:$0xff] %vm51_vm0, %v136_v38  ;;  %v113_v42 = vmax.f32 %v93_v2, 1e-24  ;;  %v112_v43 = vmax.f32 %v90_v6, 1e-24 }
  0xac   :  { %v489_v44 = vpop.eup %488  ;;  %v139_v45 = vmul.f32 %v487_v39, %v608_v16  ;;  %v316_v36 = vand.u32 127, %v315_v33 }
  0xad   :  { %v138_v47 = vmul.f32 %v489_v44, %v613_v17  ;;  %v178_v8 = vld [vmem:[#allocation2 + $0x8] sm:$0xff]  ;;  %498 = vrsqrt.f32 %v113_v42 }
  0xae   :  { %155 = vst.msk [vmem:[#allocation2 + $0x38] sm:$0xff] %vm51_vm0, %v139_v45  ;;  %v436_v49 = vpack.c.bf16 %v178_v8, %v177_v48  ;;  %500 = vrsqrt.f32 %v112_v43  ;;  %v99_v50 = vpop.xlane.xlu1 %98  ;;  %v96_v52 = vpop.xlane.xlu0 %95  ;;  %v180_v60 = vld [vmem:[#allocation2 + $0x18] sm:$0xff] }
  0xaf   :  { %v491_v53 = vpop.eup %490  ;;  %154 = vst.msk [vmem:[#allocation2 + $0x30] sm:$0xff] %vm51_vm0, %v138_v47  ;;  %v115_v16 = vmax.f32 %v99_v50, 1e-24  ;;  %v114_v17 = vmax.f32 %v96_v52, 1e-24 }
  0xb0   :  { %v493_v54 = vpop.eup %492  ;;  %438 = vmatpush3.bf16.xpose.msk.msra.mxu0 %vm715_vm2, %v436_v49  ;;  %v141_v55 = vmul.f32 %v491_v53, %v624_v22 }
  0xb1   :  { %v140_v56 = vmul.f32 %v493_v54, %v629_v23  ;;  %439 = vmatprep.subr.bf16.mxu0 %v534_v51  ;;  %502 = vrsqrt.f32 %v115_v16  ;;  %v440_v23 = vpack.c.bf16 %v180_v60, %v179_v59  ;;  %v182_v10 = vld [vmem:[#allocation2 + $0x28] sm:$0xff] }
  0xb2   :  { %157 = vst.msk [vmem:[#allocation2 + $0x48] sm:$0xff] %vm51_vm0, %v141_v55  ;;  %504 = vrsqrt.f32 %v114_v17  ;;  %v168_v57 = vpop.xlane.xlu0 %167  ;;  %v181_v7 = vld [vmem:[#allocation2 + $0x20] sm:$0xff]  ;;  %v323_v37 = vpop.permute.xlu1 %322 }
  0xb3   :  { %v495_v58 = vpop.eup %494  ;;  %156 = vst.msk [vmem:[#allocation2 + $0x40] sm:$0xff] %vm51_vm0, %v140_v56  ;;  %v169_v61 = vmax.f32 %v168_v57, 1e-24  ;;  %v444_v12 = vpack.c.bf16 %v182_v10, %v181_v7  ;;  %vm324_vm3 = vcmp.eq.s32.totalorder %v316_v36, %v323_v37 }
  0xb4   :  { %v497_v62 = vpop.eup %496  ;;  %v143_v63 = vmul.f32 %v495_v58, %v640_v28 }
  0xb5   :  { %v142_v22 = vmul.f32 %v497_v62, %v645_v29  ;;  %506 = vrsqrt.f32 %v169_v61  ;;  %v184_v18 = vld [vmem:[#allocation2 + $0x38] sm:$0xff] }
  0xb6   :  { %159 = vst.msk [vmem:[#allocation2 + $0x58] sm:$0xff] %vm51_vm0, %v143_v63  ;;  %v183_v15 = vld [vmem:[#allocation2 + $0x30] sm:$0xff] }
  0xb7   :  { %v499_v3 = vpop.eup %498  ;;  %158 = vst.msk [vmem:[#allocation2 + $0x50] sm:$0xff] %vm51_vm0, %v142_v22  ;;  %v448_v20 = vpack.c.bf16 %v184_v18, %v183_v15 }
  0xb8   :  { %v501_v4 = vpop.eup %500  ;;  %442 = vmatpush3.bf16.xpose.msk.msra.mxu0 %vm715_vm2, %v440_v23  ;;  %v145_v5 = vmul.f32 %v499_v3, %v656_v34 }
  0xb9   :  { %443 = vmatprep.subr.bf16.mxu0 %v534_v51  ;;  %v144_v28 = vmul.f32 %v501_v4, %v661_v35 }
  0xba   :  { %161 = vst.msk [vmem:[#allocation2 + $0x68] sm:$0xff] %vm51_vm0, %v145_v5 }
  0xbb   :  { %v503_v29 = vpop.eup %502  ;;  %160 = vst.msk [vmem:[#allocation2 + $0x60] sm:$0xff] %vm51_vm0, %v144_v28 }
  0xbc   :  { %v505_v11 = vpop.eup %504  ;;  %v147_v13 = vmul.f32 %v503_v29, %v672_v40  ;;  %v185_v40 = vld [vmem:[#allocation2 + $0x40] sm:$0xff] }
  0xbd   :  { %v146_v14 = vmul.f32 %v505_v11, %v677_v41  ;;  %v186_v41 = vld [vmem:[#allocation2 + $0x48] sm:$0xff]  ;;  %v188_v25 = vld [vmem:[#allocation2 + $0x58] sm:$0xff] }
  0xbe   :  { %163 = vst.msk [vmem:[#allocation2 + $0x78] sm:$0xff] %vm51_vm0, %v147_v13  ;;  %v452_v21 = vpack.c.bf16 %v186_v41, %v185_v40  ;;  %v187_v24 = vld [vmem:[#allocation2 + $0x50] sm:$0xff] }
  0xbf   :  { %v507_v34 = vpop.eup %506  ;;  %162 = vst.msk [vmem:[#allocation2 + $0x70] sm:$0xff] %vm51_vm0, %v146_v14  ;;  %v456_v26 = vpack.c.bf16 %v188_v25, %v187_v24 }
  0xc0   :  { %446 = vmatpush3.bf16.xpose.msk.msra.mxu0 %vm715_vm2, %v444_v12  ;;  %v171_v35 = vmul.f32 30.0, %v507_v34 }
  0xc1   :  { %447 = vmatprep.subr.bf16.mxu0 %v534_v51  ;;  %v190_v27 = vld [vmem:[#allocation2 + $0x68] sm:$0xff] }
  0xc2   :  { %v172_v19 = vmul.f32 %v171_v35, %v688_v46  ;;  %v189_v46 = vld [vmem:[#allocation2 + $0x60] sm:$0xff] }
  0xc3   :  { %v460_v30 = vpack.c.bf16 %v190_v27, %v189_v46 }
  0xc4   :  { %173 = vst.msk [vmem:[#allocation3] sm:$0xff] %vm51_vm0, %v172_v19 }
  0xc5   :  { %v192_v1 = vld [vmem:[#allocation2 + $0x78] sm:$0xff] }
  0xc6   :  { %v191_v0 = vld [vmem:[#allocation2 + $0x70] sm:$0xff] }
  0xc7   :  { %v464_v31 = vpack.c.bf16 %v192_v1, %v191_v0 }
  0xc8   :  { %450 = vmatpush3.bf16.xpose.msk.msra.mxu0 %vm715_vm2, %v448_v20 }
  0xc9   :  { %451 = vmatprep.subr.bf16.mxu0 %v534_v51 }
  0xcb   :  { %v176_v32 = vld [vmem:[#allocation3] sm:$0xff] }
  0xd0   :  { %454 = vmatpush3.bf16.xpose.msk.msra.mxu0 %vm715_vm2, %v452_v21 }
  0xd1   :  { %455 = vmatprep.subr.bf16.mxu0 %v534_v51 }
  0xd8   :  { %458 = vmatpush3.bf16.xpose.msk.msra.mxu0 %vm715_vm2, %v456_v26 }
  0xd9   :  { %459 = vmatprep.subr.bf16.mxu0 %v534_v51 }
  0xe0   :  { %462 = vmatpush3.bf16.xpose.msk.msra.mxu0 %vm715_vm2, %v460_v30 }
  0xe1   :  { %463 = vmatprep.subr.bf16.mxu0 %v534_v51 }
  0xe8   :  { %466 = vmatpush3.bf16.xpose.msk.msra.mxu0 %vm715_vm2, %v464_v31 }
  0xef   :  { %433 = vmatmul.mubr.msk.f32.vlgmr.msra.gmra.mrb[0].mxu0 %vm51_vm0, %v176_v32 }
 0x1c2   :  { %v311_v38 = vpop.f32.mrb[0].mxu0 }
 0x1c3   :  { %v434_v2 = vpop.f32.mrb[1].mxu0  ;;  %v325_v6 = vsel %vm324_vm3, %v311_v38, 0.0 }
 0x1c4   :  { %326 = vadd.xlane.f32.xlu0 %v325_v6 }
 0x251   :  { %v327_v39 = vpop.xlane.xlu0 %326 }
 0x252   :  { %v328_v51 = vmul.f32 0.033333335, %v327_v39 }
 0x254   :  { %v329_v42 = vmul.f32 %v328_v51, %v328_v51  ;;  %v340_v50 = vmul.f32 0.87758255, %v328_v51  ;;  %v382_v16 = vadd.f32 -0.23971277, %v328_v51  ;;  %vm343_vm6 = vcmp.gt.f32.partialorder %v328_v51, -0.87758255 }
 0x256   :  { %v330_v43 = vsub.f32 1.0, %v329_v42 }
 0x258   :  { %v331_v44 = vmax.f32 %v330_v43, 0.0 }
 0x25a   :  { %v332_v45 = vmin.f32 %v331_v44, 1.0 }
 0x25c   :  { %508 = vrsqrt.f32 %v332_v45  ;;  %vm335_vm4 = vcmp.eq.f32.partialorder %v332_v45, inf  ;;  %v338_v8 = vand.u32 2147483648, %v332_v45  ;;  %vm337_vm5 = vcmp.eq.f32.partialorder %v332_v45, 0.0 }
 0x266   :  { %v509_v47 = vpop.eup %508 }
 0x267   :  { %v334_v48 = vmul.f32 %v509_v47, %v332_v45 }
 0x269   :  { %v336_v9 = vsel %vm335_vm4, %v332_v45, %v334_v48 }
 0x26a   :  { %v339_v49 = vsel %vm337_vm5, %v338_v8, %v336_v9 }
 0x26b   :  { %v341_v52 = vmul.f32 0.47942555, %v339_v49 }
 0x26d   :  { %v342_v53 = vsub.f32 %v340_v50, %v341_v52 }
 0x26f   :  { %v345_v17 = vsel %vm343_vm6, %v342_v53, %v382_v16 }
 0x270   :  { %v346_v54 = vmul.f32 30.0, %v345_v17 }
 0x272   :  { %v347_v55 = vsub.f32 %v346_v54, %v327_v39 }
 0x274   :  { %v348_v56 = vsel %vm324_vm3, %v347_v55, 0.0 }
 0x275   :  { %v349_v57 = vadd.f32 %v348_v56, %v311_v38 }
 0x277   :  { %350 = vst [vmem:[#allocation4] sm:$0xff] %v349_v57 }
 0x278   :  { %521 = shalt.err (!%p518_p4)
}
 0x279   :  { %s522_s23 = scalar_lea.hbm %s780_s3, 128 }
 0x27a   :  { %p523_p5 = scmp.ne.s32.totalorder %s780_s3, %s522_s23  ;;  %p526_p6 = scmp.lt.u32.totalorder %s522_s23, %s780_s3 }
 0x27c   :  { %p528_p7 = pnand %p526_p6, %p523_p5 }
 0x27e   :  { %531 = shalt.err (!%p528_p7)
}
 0x27f   :  { %360 = dma.vmem_to_hbm [thread:$0]  %s358_s19, 128, %s780_s3, [#allocation5]  }
 0x280   :  { %532 = dma.done.wait [#allocation5], 128  }
 0x281   :  { %533 = vsyncadd [#allocation5], 4294967168 }
 0x282   :  { %364 = vsyncpa [#allocation5], 1 }

</bundles_post_ra>
